<compile_context>
chip_gen: v5e
topology: v5e:2x2
jax: 0.10.0
libtpu: 0.0.40
codegen_flags: <defaults>
</compile_context>

<pallas_src>
import math
import functools

import jax
import jax.numpy as jnp
from jax import lax
from jax.experimental import pallas as pl
from jax.experimental.pallas import tpu as pltpu


def _pick_block(dim, target):
    """Largest candidate tile <= target that evenly divides dim (else dim)."""
    if dim <= target:
        return dim
    for cand in sorted({target, 512, 256, 128, 64, 32, 16, 8}, reverse=True):
        if cand <= target and dim % cand == 0:
            return cand
    return dim


# ---------------------------------------------------------------------------
# Main path: flash-attention kernel over a compacted (lt, st) grid axis.
# Inputs carry heads folded into the lane dim: Q (1, tq, H*E), K (1, tk, H*E),
# V (1, tk, H*D); output block is (1, tq, H*D) (lane-dense).
# ---------------------------------------------------------------------------
def _flash_attention_kernel(lt_ref, st_ref, q_ref, k_ref, v_ref, o_ref,
                            qs_ref, m_ref, l_ref, acc_ref, *,
                            scale, mask_flag, heads, e_dim, d_dim,
                            block_q, block_k, n_kv_blocks, compute_dtype):
    t = pl.program_id(1)
    lt = lt_ref[t]          # L-tile index of this flattened step (scalar, SMEM)
    st = st_ref[t]          # kv-tile index of this flattened step

    @pl.when(st == 0)
    def _init():
        m_ref[...] = jnp.full_like(m_ref, -jnp.inf)
        l_ref[...] = jnp.zeros_like(l_ref)
        acc_ref[...] = jnp.zeros_like(acc_ref)
        # Scale folded into Q once per L-tile (reused for every kv step).
        # -inf masking commutes with positive scaling, so semantics match.
        qs_ref[...] = (q_ref[0] * scale).astype(compute_dtype)

    q_start = lt * block_q
    k_start = st * block_k

    def _accumulate(apply_mask):
        q_all = qs_ref[...]                                   # (tq, H*E)
        k_all = k_ref[0].astype(compute_dtype)                # (tk, H*E)
        v_all = v_ref[0].astype(compute_dtype)                # (tk, H*D)
        if apply_mask:
            row = q_start + lax.broadcasted_iota(jnp.int32, (block_q, 1), 0)
            col = k_start + lax.broadcasted_iota(jnp.int32, (1, block_k), 1)
            dead = col > row                                  # (tq, tk) bool
        for h in range(heads):
            q_h = q_all[:, h * e_dim:(h + 1) * e_dim]         # (tq, E)
            k_h = k_all[:, h * e_dim:(h + 1) * e_dim]         # (tk, E)
            # QK^T: contract last dims (no explicit k.T relayout).
            s = lax.dot_general(q_h, k_h, (((1,), (1,)), ((), ())),
                                preferred_element_type=jnp.float32)  # (tq, tk)
            if apply_mask:
                s = jnp.where(dead, -jnp.inf, s)

            m_prev = m_ref[h]                                 # (tq, 1)
            m_new = jnp.maximum(m_prev, jnp.max(s, axis=-1, keepdims=True))
            alpha = jnp.exp(m_prev - m_new)
            p = jnp.exp(s - m_new)                            # (tq, tk)
            l_ref[h] = alpha * l_ref[h] + jnp.sum(p, axis=-1, keepdims=True)

            v_h = v_all[:, h * d_dim:(h + 1) * d_dim]         # (tk, D)
            pv = jnp.dot(p.astype(compute_dtype), v_h,
                         preferred_element_type=jnp.float32)  # (tq, D)
            acc_ref[h] = alpha * acc_ref[h] + pv
            m_ref[h] = m_new

    if mask_flag:
        # The compacted grid contains only live blocks; distinguish blocks that
        # straddle the diagonal (need the mask) from fully-unmasked interiors.
        diag = (k_start + (block_k - 1)) > q_start

        @pl.when(diag)
        def _masked_block():
            _accumulate(apply_mask=True)

        @pl.when(jnp.logical_not(diag))
        def _interior_block():
            _accumulate(apply_mask=False)

        last_st = jnp.minimum(n_kv_blocks - 1,
                              (lt * block_q + block_q - 1) // block_k)
    else:
        _accumulate(apply_mask=False)
        last_st = n_kv_blocks - 1

    @pl.when(st == last_st)
    def _finalize():
        outs = []
        for h in range(heads):
            inv_l = pl.reciprocal(l_ref[h], approx=True)      # EUP vrcp
            outs.append(acc_ref[h] * inv_l)
        o_ref[0] = jnp.concatenate(outs, axis=-1).astype(o_ref.dtype)


# ---------------------------------------------------------------------------
# Debug path: also materialises attention probabilities (output_attention=True).
# Tiled over L only; full S per step (the A output is inherently O(L*S) HBM).
# ---------------------------------------------------------------------------
def _attention_with_probs_kernel(q_ref, k_ref, v_ref, o_ref, a_ref, *,
                                 scale, mask_flag, heads, e_dim, d_dim,
                                 block_q, compute_dtype):
    lt = pl.program_id(1)
    q_all = (q_ref[0] * scale).astype(compute_dtype)          # (tq, H*E)
    k_all = k_ref[0].astype(compute_dtype)                    # (S, H*E)
    v_all = v_ref[0].astype(compute_dtype)                    # (S, H*D)
    s_len = k_all.shape[0]

    if mask_flag:
        row = lt * block_q + lax.broadcasted_iota(jnp.int32, (block_q, 1), 0)
        col = lax.broadcasted_iota(jnp.int32, (1, s_len), 1)
        dead = col > row                                      # (tq, S)

    outs = []
    for h in range(heads):
        q_h = q_all[:, h * e_dim:(h + 1) * e_dim]
        k_h = k_all[:, h * e_dim:(h + 1) * e_dim]
        s = lax.dot_general(q_h, k_h, (((1,), (1,)), ((), ())),
                            preferred_element_type=jnp.float32)   # (tq, S)
        if mask_flag:
            s = jnp.where(dead, -jnp.inf, s)
        m = jnp.max(s, axis=-1, keepdims=True)
        p = jnp.exp(s - m)
        denom = jnp.sum(p, axis=-1, keepdims=True)
        attn = p / denom                      # exact division in the debug path
        v_h = v_all[:, h * d_dim:(h + 1) * d_dim]
        out_h = jnp.dot(attn.astype(compute_dtype), v_h,
                        preferred_element_type=jnp.float32)       # (tq, D)
        a_ref[0, h] = attn.astype(a_ref.dtype)
        outs.append(out_h)
    o_ref[0] = jnp.concatenate(outs, axis=-1).astype(o_ref.dtype)


# ---------------------------------------------------------------------------
# Wrapper
# ---------------------------------------------------------------------------
def full_attention(queries, keys, values, attn_mask=None, *,
                   mask_flag=True, scale=None, output_attention=False,
                   block_q=256, block_k=256, compute_dtype=jnp.bfloat16):
    """Pallas implementation of FullAttention.forward (eval mode).

    queries: (B, L, H, E), keys: (B, S, H, E), values: (B, S, H, D)
    Returns (V, A) with V: (B, L, H, D); A is None unless output_attention.

    block_q / block_k: per-generation tuning knobs — ~256/256 on v7x, up to
    512/256-512 on v6e, 256-512/128-256 on v5e.  compute_dtype defaults to
    bf16 MXU operands with f32 accumulation; pass jnp.float32 for exact math.
    """
    if attn_mask is not None:
        raise NotImplementedError("explicit attn_mask is not supported")

    B, L, H, E = queries.shape
    _, S, _, D = values.shape
    sc = float(scale) if scale else 1.0 / math.sqrt(E)   # matches `scale or ...`
    compute_dtype = jnp.dtype(compute_dtype)

    tq = _pick_block(L, block_q)
    tk = _pick_block(S, block_k)
    n_lt = L // tq
    n_st = S // tk

    # Free reshapes (contiguous): fold heads into the lane dimension.
    q2 = queries.reshape(B, L, H * E)
    k2 = keys.reshape(B, S, H * E)
    v2 = values.reshape(B, S, H * D)

    if not output_attention:
        # Compacted (lt, st) grid: only live block pairs (for causal, blocks
        # entirely above the diagonal are omitted -> no dead grid steps).
        lt_list, st_list = [], []
        for lt in range(n_lt):
            if mask_flag:
                last = min(n_st - 1, (lt * tq + tq - 1) // tk)
            else:
                last = n_st - 1
            for st in range(last + 1):
                lt_list.append(lt)
                st_list.append(st)
        lt_map = jnp.asarray(lt_list, dtype=jnp.int32)
        st_map = jnp.asarray(st_list, dtype=jnp.int32)
        n_steps = len(lt_list)

        kernel = functools.partial(
            _flash_attention_kernel, scale=sc, mask_flag=mask_flag,
            heads=H, e_dim=E, d_dim=D, block_q=tq, block_k=tk,
            n_kv_blocks=n_st, compute_dtype=compute_dtype)

        out = pl.pallas_call(
            kernel,
            out_shape=jax.ShapeDtypeStruct((B, L, H * D), queries.dtype),
            grid_spec=pltpu.PrefetchScalarGridSpec(
                num_scalar_prefetch=2,
                grid=(B, n_steps),
                in_specs=[
                    pl.BlockSpec((1, tq, H * E),
                                 lambda b, t, ltm, stm: (b, ltm[t], 0)),
                    pl.BlockSpec((1, tk, H * E),
                                 lambda b, t, ltm, stm: (b, stm[t], 0)),
                    pl.BlockSpec((1, tk, H * D),
                                 lambda b, t, ltm, stm: (b, stm[t], 0)),
                ],
                out_specs=pl.BlockSpec((1, tq, H * D),
                                       lambda b, t, ltm, stm: (b, ltm[t], 0)),
                scratch_shapes=[
                    pltpu.VMEM((tq, H * E), compute_dtype),   # scaled+cast Q
                    pltpu.VMEM((H, tq, 1), jnp.float32),      # running max m
                    pltpu.VMEM((H, tq, 1), jnp.float32),      # running sum l
                    pltpu.VMEM((H, tq, D), jnp.float32),      # output accum
                ],
            ),
            compiler_params=pltpu.CompilerParams(
                dimension_semantics=("parallel", "arbitrary"),
                vmem_limit_bytes=32 * 1024 * 1024,
            ),
        )(lt_map, st_map, q2, k2, v2)
        V = out.reshape(B, L, H, D)
        return V, None

    # output_attention=True: debug path, also returns the (B, H, L, S) matrix.
    kernel = functools.partial(
        _attention_with_probs_kernel, scale=sc, mask_flag=mask_flag,
        heads=H, e_dim=E, d_dim=D, block_q=tq, compute_dtype=compute_dtype)

    out, attn = pl.pallas_call(
        kernel,
        out_shape=(
            jax.ShapeDtypeStruct((B, L, H * D), queries.dtype),
            jax.ShapeDtypeStruct((B, H, L, S), queries.dtype),
        ),
        grid_spec=pltpu.PrefetchScalarGridSpec(
            num_scalar_prefetch=0,
            grid=(B, n_lt),
            in_specs=[
                pl.BlockSpec((1, tq, H * E), lambda b, lt: (b, lt, 0)),
                pl.BlockSpec((1, S, H * E), lambda b, lt: (b, 0, 0)),
                pl.BlockSpec((1, S, H * D), lambda b, lt: (b, 0, 0)),
            ],
            out_specs=[
                pl.BlockSpec((1, tq, H * D), lambda b, lt: (b, lt, 0)),
                pl.BlockSpec((1, H, tq, S), lambda b, lt: (b, 0, lt, 0)),
            ],
        ),
        compiler_params=pltpu.CompilerParams(
            dimension_semantics=("parallel", "parallel"),
            vmem_limit_bytes=32 * 1024 * 1024,
        ),
    )(q2, k2, v2)

    V = out.reshape(B, L, H, D)
    return V, attn


# ---------------------------------------------------------------------------
# Pure-JAX reference (matches the PyTorch module in eval mode).
# ---------------------------------------------------------------------------
def _reference(queries, keys, values, *, mask_flag=True, scale=None):
    B, L, H, E = queries.shape
    _, S, _, D = values.shape
    sc = scale if scale else 1.0 / math.sqrt(E)
    scores = jnp.einsum('blhe,bshe->bhls', queries, keys)
    if mask_flag:
        mask = jnp.triu(jnp.ones((L, S), dtype=bool), k=1)
        scores = jnp.where(mask[None, None], -jnp.inf, scores)
    A = jax.nn.softmax(sc * scores, axis=-1)
    V = jnp.einsum('bhls,bshd->blhd', A, values)
    return V, A


if __name__ == "__main__":
    # --- Test 1: tiny shapes, causal, attention-probability output, f32. ----
    B, L, S, H, E, D = 2, 8, 8, 4, 32, 32
    kq, kk, kv = jax.random.split(jax.random.PRNGKey(0), 3)
    queries = jax.random.normal(kq, (B, L, H, E), dtype=jnp.float32)
    keys_in = jax.random.normal(kk, (B, S, H, E), dtype=jnp.float32)
    values = jax.random.normal(kv, (B, S, H, D), dtype=jnp.float32)

    V, A = full_attention(queries, keys_in, values, attn_mask=None,
                          mask_flag=True, output_attention=True,
                          compute_dtype=jnp.float32)
    V = jax.block_until_ready(V)
    A = jax.block_until_ready(A)
    V_ref, A_ref = _reference(queries, keys_in, values, mask_flag=True)
    assert jnp.allclose(V, V_ref, atol=2e-3, rtol=2e-3), "V mismatch (test 1)"
    assert jnp.allclose(A, A_ref, atol=2e-3, rtol=2e-3), "A mismatch (test 1)"

    # --- Test 2: compacted causal flash path, uneven tiles, f32 compute. ----
    B2, L2, H2, E2, D2 = 2, 256, 4, 32, 32
    kq2, kk2, kv2 = jax.random.split(jax.random.PRNGKey(1), 3)
    q2 = jax.random.normal(kq2, (B2, L2, H2, E2), dtype=jnp.float32)
    k2 = jax.random.normal(kk2, (B2, L2, H2, E2), dtype=jnp.float32)
    v2 = jax.random.normal(kv2, (B2, L2, H2, D2), dtype=jnp.float32)

    V2, A2 = full_attention(q2, k2, v2, mask_flag=True, output_attention=False,
                            block_q=64, block_k=32, compute_dtype=jnp.float32)
    V2 = jax.block_until_ready(V2)
    V2_ref, _ = _reference(q2, k2, v2, mask_flag=True)
    assert A2 is None
    assert jnp.allclose(V2, V2_ref, atol=5e-3, rtol=5e-3), "V mismatch (test 2)"

    # --- Test 3: causal flash path, default bf16 MXU operands. --------------
    V3, _ = full_attention(q2, k2, v2, mask_flag=True, output_attention=False,
                           block_q=64, block_k=64)
    V3 = jax.block_until_ready(V3)
    assert jnp.allclose(V3, V2_ref, atol=5e-2, rtol=5e-2), "V mismatch (test 3)"

    # --- Test 4: non-causal, default tiles (single kv block), bf16. ---------
    V4, _ = full_attention(q2, k2, v2, mask_flag=False, output_attention=False)
    V4 = jax.block_until_ready(V4)
    V4_ref, _ = _reference(q2, k2, v2, mask_flag=False)
    assert jnp.allclose(V4, V4_ref, atol=5e-2, rtol=5e-2), "V mismatch (test 4)"

    print("KERNEL_OK")
</pallas_src>

<mosaic_0001>
module attributes {stable_mosaic.version = 11 : i64} {
  func.func @_attention_with_probs_kernel(%arg0: i32, %arg1: i32, %arg2: memref<1x8x128xf32, #tpu.memory_space<vmem>>, %arg3: memref<1x8x128xf32, #tpu.memory_space<vmem>>, %arg4: memref<1x8x128xf32, #tpu.memory_space<vmem>>, %arg5: memref<1x8x128xf32, #tpu.memory_space<vmem>>, %arg6: memref<1x4x8x8xf32, #tpu.memory_space<vmem>>) attributes {dimension_semantics = [#tpu.dimension_semantics<parallel>, #tpu.dimension_semantics<parallel>], iteration_bounds = array<i64: 2, 1>, scalar_prefetch = 0 : i64, scratch_operands = 0 : i64, tpu.core_type = #tpu.core_type<tc>, window_params = [{transform_indices = @transform_0, window_bounds = array<i64: 1, 8, 128>}, {transform_indices = @transform_1, window_bounds = array<i64: 1, 8, 128>}, {transform_indices = @transform_2, window_bounds = array<i64: 1, 8, 128>}, {transform_indices = @transform_3, window_bounds = array<i64: 1, 8, 128>}, {transform_indices = @transform_4, window_bounds = array<i64: 1, 4, 8, 8>}]} {
    %c0 = arith.constant 0 : index
    %c0_0 = arith.constant 0 : index
    %c0_1 = arith.constant 0 : index
    %0 = vector.load %arg2[%c0, %c0_0, %c0_1] : memref<1x8x128xf32, #tpu.memory_space<vmem>>, vector<1x8x128xf32>
    %1 = vector.shape_cast %0 : vector<1x8x128xf32> to vector<8x128xf32>
    %cst = arith.constant 0.176776692 : f32
    %2 = vector.broadcast %cst : f32 to vector<8x128xf32>
    %3 = arith.mulf %1, %2 : vector<8x128xf32>
    %c0_2 = arith.constant 0 : index
    %c0_3 = arith.constant 0 : index
    %c0_4 = arith.constant 0 : index
    %4 = vector.load %arg3[%c0_2, %c0_3, %c0_4] : memref<1x8x128xf32, #tpu.memory_space<vmem>>, vector<1x8x128xf32>
    %5 = vector.shape_cast %4 : vector<1x8x128xf32> to vector<8x128xf32>
    %c0_5 = arith.constant 0 : index
    %c0_6 = arith.constant 0 : index
    %c0_7 = arith.constant 0 : index
    %6 = vector.load %arg4[%c0_5, %c0_6, %c0_7] : memref<1x8x128xf32, #tpu.memory_space<vmem>>, vector<1x8x128xf32>
    %7 = vector.shape_cast %6 : vector<1x8x128xf32> to vector<8x128xf32>
    %c8_i32 = arith.constant 8 : i32
    %8 = arith.muli %arg1, %c8_i32 : i32
    %9 = tpu.iota {dimensions = array<i32: 0>} : vector<8x1xi32>
    %10 = vector.broadcast %8 : i32 to vector<8x1xi32>
    %11 = arith.addi %10, %9 : vector<8x1xi32>
    %12 = tpu.iota {dimensions = array<i32: 1>} : vector<1x8xi32>
    %13 = vector.broadcast %12 : vector<1x8xi32> to vector<8x8xi32>
    %14 = vector.broadcast %11 : vector<8x1xi32> to vector<8x8xi32>
    %15 = arith.cmpi sgt, %13, %14 : vector<8x8xi32>
    %16 = vector.extract_strided_slice %3 {offsets = [0, 0], sizes = [8, 32], strides = [1, 1]} : vector<8x128xf32> to vector<8x32xf32>
    %17 = vector.extract_strided_slice %5 {offsets = [0, 0], sizes = [8, 32], strides = [1, 1]} : vector<8x128xf32> to vector<8x32xf32>
    %cst_8 = arith.constant dense<0.000000e+00> : vector<8x8xf32>
    %18 = tpu.matmul %16, %17, %cst_8 {dimension_numbers = #tpu.dot_dimension_numbers<[1], [1], [0], [0], [0, 0, 1, 0], [], []>} : vector<8x32xf32>, vector<8x32xf32>, vector<8x8xf32> -> vector<8x8xf32>
    %cst_9 = arith.constant 0xFF800000 : f32
    %19 = vector.broadcast %cst_9 : f32 to vector<8x8xf32>
    %20 = arith.select %15, %19, %18 : vector<8x8xi1>, vector<8x8xf32>
    %cst_10 = arith.constant dense<0xFF800000> : vector<8xf32>
    %21 = vector.multi_reduction <maximumf>, %20, %cst_10 [1] : vector<8x8xf32> to vector<8xf32>
    %22 = vector.shape_cast %21 : vector<8xf32> to vector<8x1xf32>
    %23 = vector.broadcast %22 : vector<8x1xf32> to vector<8x8xf32>
    %24 = arith.subf %20, %23 : vector<8x8xf32>
    %25 = math.exp %24 : vector<8x8xf32>
    %cst_11 = arith.constant dense<0.000000e+00> : vector<8xf32>
    %26 = vector.multi_reduction <add>, %25, %cst_11 [1] : vector<8x8xf32> to vector<8xf32>
    %27 = vector.shape_cast %26 : vector<8xf32> to vector<8x1xf32>
    %28 = vector.broadcast %27 : vector<8x1xf32> to vector<8x8xf32>
    %29 = arith.divf %25, %28 : vector<8x8xf32>
    %30 = vector.extract_strided_slice %7 {offsets = [0, 0], sizes = [8, 32], strides = [1, 1]} : vector<8x128xf32> to vector<8x32xf32>
    %cst_12 = arith.constant dense<0.000000e+00> : vector<8x32xf32>
    %31 = tpu.matmul %29, %30, %cst_12 {dimension_numbers = #tpu.dot_dimension_numbers<[1], [0], [0], [1], [0, 0, 1, 1], [], []>} : vector<8x8xf32>, vector<8x32xf32>, vector<8x32xf32> -> vector<8x32xf32>
    %c0_13 = arith.constant 0 : index
    %c0_14 = arith.constant 0 : index
    %c0_15 = arith.constant 0 : index
    %c0_16 = arith.constant 0 : index
    %32 = vector.load %arg6[%c0_13, %c0_14, %c0_15, %c0_16] : memref<1x4x8x8xf32, #tpu.memory_space<vmem>>, vector<1x1x8x8xf32>
    %33 = vector.shape_cast %32 : vector<1x1x8x8xf32> to vector<8x8xf32>
    %34 = vector.shape_cast %29 : vector<8x8xf32> to vector<1x1x8x8xf32>
    tpu.vector_store %arg6[%c0_13, %c0_14, %c0_15, %c0_16], %34 {strides = array<i32>} : memref<1x4x8x8xf32, #tpu.memory_space<vmem>>, vector<1x1x8x8xf32>,
    %35 = vector.extract_strided_slice %3 {offsets = [0, 32], sizes = [8, 32], strides = [1, 1]} : vector<8x128xf32> to vector<8x32xf32>
    %36 = vector.extract_strided_slice %5 {offsets = [0, 32], sizes = [8, 32], strides = [1, 1]} : vector<8x128xf32> to vector<8x32xf32>
    %cst_17 = arith.constant dense<0.000000e+00> : vector<8x8xf32>
    %37 = tpu.matmul %35, %36, %cst_17 {dimension_numbers = #tpu.dot_dimension_numbers<[1], [1], [0], [0], [0, 0, 1, 0], [], []>} : vector<8x32xf32>, vector<8x32xf32>, vector<8x8xf32> -> vector<8x8xf32>
    %cst_18 = arith.constant 0xFF800000 : f32
    %38 = vector.broadcast %cst_18 : f32 to vector<8x8xf32>
    %39 = arith.select %15, %38, %37 : vector<8x8xi1>, vector<8x8xf32>
    %cst_19 = arith.constant dense<0xFF800000> : vector<8xf32>
    %40 = vector.multi_reduction <maximumf>, %39, %cst_19 [1] : vector<8x8xf32> to vector<8xf32>
    %41 = vector.shape_cast %40 : vector<8xf32> to vector<8x1xf32>
    %42 = vector.broadcast %41 : vector<8x1xf32> to vector<8x8xf32>
    %43 = arith.subf %39, %42 : vector<8x8xf32>
    %44 = math.exp %43 : vector<8x8xf32>
    %cst_20 = arith.constant dense<0.000000e+00> : vector<8xf32>
    %45 = vector.multi_reduction <add>, %44, %cst_20 [1] : vector<8x8xf32> to vector<8xf32>
    %46 = vector.shape_cast %45 : vector<8xf32> to vector<8x1xf32>
    %47 = vector.broadcast %46 : vector<8x1xf32> to vector<8x8xf32>
    %48 = arith.divf %44, %47 : vector<8x8xf32>
    %49 = vector.extract_strided_slice %7 {offsets = [0, 32], sizes = [8, 32], strides = [1, 1]} : vector<8x128xf32> to vector<8x32xf32>
    %cst_21 = arith.constant dense<0.000000e+00> : vector<8x32xf32>
    %50 = tpu.matmul %48, %49, %cst_21 {dimension_numbers = #tpu.dot_dimension_numbers<[1], [0], [0], [1], [0, 0, 1, 1], [], []>} : vector<8x8xf32>, vector<8x32xf32>, vector<8x32xf32> -> vector<8x32xf32>
    %c0_22 = arith.constant 0 : index
    %c1 = arith.constant 1 : index
    %c0_23 = arith.constant 0 : index
    %c0_24 = arith.constant 0 : index
    %51 = vector.load %arg6[%c0_22, %c1, %c0_23, %c0_24] : memref<1x4x8x8xf32, #tpu.memory_space<vmem>>, vector<1x1x8x8xf32>
    %52 = vector.shape_cast %51 : vector<1x1x8x8xf32> to vector<8x8xf32>
    %53 = vector.shape_cast %48 : vector<8x8xf32> to vector<1x1x8x8xf32>
    tpu.vector_store %arg6[%c0_22, %c1, %c0_23, %c0_24], %53 {strides = array<i32>} : memref<1x4x8x8xf32, #tpu.memory_space<vmem>>, vector<1x1x8x8xf32>,
    %54 = vector.extract_strided_slice %3 {offsets = [0, 64], sizes = [8, 32], strides = [1, 1]} : vector<8x128xf32> to vector<8x32xf32>
    %55 = vector.extract_strided_slice %5 {offsets = [0, 64], sizes = [8, 32], strides = [1, 1]} : vector<8x128xf32> to vector<8x32xf32>
    %cst_25 = arith.constant dense<0.000000e+00> : vector<8x8xf32>
    %56 = tpu.matmul %54, %55, %cst_25 {dimension_numbers = #tpu.dot_dimension_numbers<[1], [1], [0], [0], [0, 0, 1, 0], [], []>} : vector<8x32xf32>, vector<8x32xf32>, vector<8x8xf32> -> vector<8x8xf32>
    %cst_26 = arith.constant 0xFF800000 : f32
    %57 = vector.broadcast %cst_26 : f32 to vector<8x8xf32>
    %58 = arith.select %15, %57, %56 : vector<8x8xi1>, vector<8x8xf32>
    %cst_27 = arith.constant dense<0xFF800000> : vector<8xf32>
    %59 = vector.multi_reduction <maximumf>, %58, %cst_27 [1] : vector<8x8xf32> to vector<8xf32>
    %60 = vector.shape_cast %59 : vector<8xf32> to vector<8x1xf32>
    %61 = vector.broadcast %60 : vector<8x1xf32> to vector<8x8xf32>
    %62 = arith.subf %58, %61 : vector<8x8xf32>
    %63 = math.exp %62 : vector<8x8xf32>
    %cst_28 = arith.constant dense<0.000000e+00> : vector<8xf32>
    %64 = vector.multi_reduction <add>, %63, %cst_28 [1] : vector<8x8xf32> to vector<8xf32>
    %65 = vector.shape_cast %64 : vector<8xf32> to vector<8x1xf32>
    %66 = vector.broadcast %65 : vector<8x1xf32> to vector<8x8xf32>
    %67 = arith.divf %63, %66 : vector<8x8xf32>
    %68 = vector.extract_strided_slice %7 {offsets = [0, 64], sizes = [8, 32], strides = [1, 1]} : vector<8x128xf32> to vector<8x32xf32>
    %cst_29 = arith.constant dense<0.000000e+00> : vector<8x32xf32>
    %69 = tpu.matmul %67, %68, %cst_29 {dimension_numbers = #tpu.dot_dimension_numbers<[1], [0], [0], [1], [0, 0, 1, 1], [], []>} : vector<8x8xf32>, vector<8x32xf32>, vector<8x32xf32> -> vector<8x32xf32>
    %c0_30 = arith.constant 0 : index
    %c2 = arith.constant 2 : index
    %c0_31 = arith.constant 0 : index
    %c0_32 = arith.constant 0 : index
    %70 = vector.load %arg6[%c0_30, %c2, %c0_31, %c0_32] : memref<1x4x8x8xf32, #tpu.memory_space<vmem>>, vector<1x1x8x8xf32>
    %71 = vector.shape_cast %70 : vector<1x1x8x8xf32> to vector<8x8xf32>
    %72 = vector.shape_cast %67 : vector<8x8xf32> to vector<1x1x8x8xf32>
    tpu.vector_store %arg6[%c0_30, %c2, %c0_31, %c0_32], %72 {strides = array<i32>} : memref<1x4x8x8xf32, #tpu.memory_space<vmem>>, vector<1x1x8x8xf32>,
    %73 = vector.extract_strided_slice %3 {offsets = [0, 96], sizes = [8, 32], strides = [1, 1]} : vector<8x128xf32> to vector<8x32xf32>
    %74 = vector.extract_strided_slice %5 {offsets = [0, 96], sizes = [8, 32], strides = [1, 1]} : vector<8x128xf32> to vector<8x32xf32>
    %cst_33 = arith.constant dense<0.000000e+00> : vector<8x8xf32>
    %75 = tpu.matmul %73, %74, %cst_33 {dimension_numbers = #tpu.dot_dimension_numbers<[1], [1], [0], [0], [0, 0, 1, 0], [], []>} : vector<8x32xf32>, vector<8x32xf32>, vector<8x8xf32> -> vector<8x8xf32>
    %cst_34 = arith.constant 0xFF800000 : f32
    %76 = vector.broadcast %cst_34 : f32 to vector<8x8xf32>
    %77 = arith.select %15, %76, %75 : vector<8x8xi1>, vector<8x8xf32>
    %cst_35 = arith.constant dense<0xFF800000> : vector<8xf32>
    %78 = vector.multi_reduction <maximumf>, %77, %cst_35 [1] : vector<8x8xf32> to vector<8xf32>
    %79 = vector.shape_cast %78 : vector<8xf32> to vector<8x1xf32>
    %80 = vector.broadcast %79 : vector<8x1xf32> to vector<8x8xf32>
    %81 = arith.subf %77, %80 : vector<8x8xf32>
    %82 = math.exp %81 : vector<8x8xf32>
    %cst_36 = arith.constant dense<0.000000e+00> : vector<8xf32>
    %83 = vector.multi_reduction <add>, %82, %cst_36 [1] : vector<8x8xf32> to vector<8xf32>
    %84 = vector.shape_cast %83 : vector<8xf32> to vector<8x1xf32>
    %85 = vector.broadcast %84 : vector<8x1xf32> to vector<8x8xf32>
    %86 = arith.divf %82, %85 : vector<8x8xf32>
    %87 = vector.extract_strided_slice %7 {offsets = [0, 96], sizes = [8, 32], strides = [1, 1]} : vector<8x128xf32> to vector<8x32xf32>
    %cst_37 = arith.constant dense<0.000000e+00> : vector<8x32xf32>
    %88 = tpu.matmul %86, %87, %cst_37 {dimension_numbers = #tpu.dot_dimension_numbers<[1], [0], [0], [1], [0, 0, 1, 1], [], []>} : vector<8x8xf32>, vector<8x32xf32>, vector<8x32xf32> -> vector<8x32xf32>
    %c0_38 = arith.constant 0 : index
    %c3 = arith.constant 3 : index
    %c0_39 = arith.constant 0 : index
    %c0_40 = arith.constant 0 : index
    %89 = vector.load %arg6[%c0_38, %c3, %c0_39, %c0_40] : memref<1x4x8x8xf32, #tpu.memory_space<vmem>>, vector<1x1x8x8xf32>
    %90 = vector.shape_cast %89 : vector<1x1x8x8xf32> to vector<8x8xf32>
    %91 = vector.shape_cast %86 : vector<8x8xf32> to vector<1x1x8x8xf32>
    tpu.vector_store %arg6[%c0_38, %c3, %c0_39, %c0_40], %91 {strides = array<i32>} : memref<1x4x8x8xf32, #tpu.memory_space<vmem>>, vector<1x1x8x8xf32>,
    %92 = tpu.concatenate %31, %50, %69, %88 in 1 : vector<8x32xf32>, vector<8x32xf32>, vector<8x32xf32>, vector<8x32xf32> -> vector<8x128xf32>
    %c0_41 = arith.constant 0 : index
    %c0_42 = arith.constant 0 : index
    %c0_43 = arith.constant 0 : index
    %93 = vector.load %arg5[%c0_41, %c0_42, %c0_43] : memref<1x8x128xf32, #tpu.memory_space<vmem>>, vector<1x8x128xf32>
    %94 = vector.shape_cast %93 : vector<1x8x128xf32> to vector<8x128xf32>
    %95 = vector.shape_cast %92 : vector<8x128xf32> to vector<1x8x128xf32>
    tpu.vector_store %arg5[%c0_41, %c0_42, %c0_43], %95 {strides = array<i32>} : memref<1x8x128xf32, #tpu.memory_space<vmem>>, vector<1x8x128xf32>,
    return
  }
  func.func @transform_0(%arg0: i32, %arg1: i32) -> (i32, i32, i32) {
    %c0_i32 = arith.constant 0 : i32
    %c0_i32_0 = arith.constant 0 : i32
    return %arg0, %arg1, %c0_i32 : i32, i32, i32
  }
  func.func @transform_1(%arg0: i32, %arg1: i32) -> (i32, i32, i32) {
    %c0_i32 = arith.constant 0 : i32
    %c0_i32_0 = arith.constant 0 : i32
    %c0_i32_1 = arith.constant 0 : i32
    return %arg0, %c0_i32, %c0_i32_0 : i32, i32, i32
  }
  func.func @transform_2(%arg0: i32, %arg1: i32) -> (i32, i32, i32) {
    %c0_i32 = arith.constant 0 : i32
    %c0_i32_0 = arith.constant 0 : i32
    %c0_i32_1 = arith.constant 0 : i32
    return %arg0, %c0_i32, %c0_i32_0 : i32, i32, i32
  }
  func.func @transform_3(%arg0: i32, %arg1: i32) -> (i32, i32, i32) {
    %c0_i32 = arith.constant 0 : i32
    %c0_i32_0 = arith.constant 0 : i32
    return %arg0, %arg1, %c0_i32 : i32, i32, i32
  }
  func.func @transform_4(%arg0: i32, %arg1: i32) -> (i32, i32, i32, i32) {
    %c0_i32 = arith.constant 0 : i32
    %c0_i32_0 = arith.constant 0 : i32
    %c0_i32_1 = arith.constant 0 : i32
    return %arg0, %c0_i32, %arg1, %c0_i32_0 : i32, i32, i32, i32
  }
}

</mosaic_0001>

<bundles_post_ra>
// kernel: tpu_custom_call.1
= control target key start
LH: loop header
LB: loop body
LE: loop exit
PB: predicated region body
PF: predicated region fallthrough
CT: control target
= control target key end

     0   :  { %s1491_s0 = inlined_call_operand.hbm [shape: f32[2,8,128], index: 0, kind: input, shape index: {}]   ;;  %s1492_s1 = inlined_call_operand.hbm [shape: f32[2,8,128], index: 1, kind: input, shape index: {}]   ;;  %s1493_s2 = inlined_call_operand.hbm [shape: f32[2,8,128], index: 2, kind: input, shape index: {}]   ;;  %s1494_s3 = inlined_call_operand.hbm [shape: f32[2,8,128], index: 3, kind: output, shape index: {0}]   ;;  %s1495_s4 = inlined_call_operand.hbm [shape: f32[2,4,8,8], index: 4, kind: output, shape index: {1}]  }
   0x1   :  { %1499 = sst [smem:[#allocation19_spill]] %s1492_s1 }
   0x2   :  { %10 = vsyncpa [#allocation3], 0 }
   0x3   :  { %12 = vsyncpa [#allocation3 + $0x1], 0 }
   0x4   :  { %13 = vsyncpa [#allocation6], 0 }
   0x5   :  { %15 = vsyncpa [#allocation6 + $0x1], 0 }
   0x6   :  { %16 = vsyncpa [#allocation4], 0 }
   0x7   :  { %18 = vsyncpa [#allocation4 + $0x1], 0 }
   0x8   :  { %19 = vsyncpa [#allocation10], 0 }
   0x9   :  { %21 = vsyncpa [#allocation10 + $0x1], 0  ;;  %s1246_s15 = smov 0   ;;  %s1248_s16 = smov 0  }
   0xa   :  { %s1250_s17 = smov 0   ;;  %s1252_s18 = smov 0  }
   0xb   :  { %s1254_s19 = smov 0   ;;  %s1256_s20 = smov 0  }
   0xc LB: > { %1500 = sst [smem:[#allocation15_spill]] %s1202_s17  ;;  %s1277_s21 = sadd.s32 4294967295, %s1214_s20   ;;  %s1214_s20 = sphi %s1256_s20, %s27_s20   ;;  %s1210_s19 = sphi %s1254_s19, %s1514_s19   ;;  %s1206_s18 = sphi %s1252_s18, %s1513_s18   ;;  %s1202_s17 = sphi %s1250_s17, %s1512_s17   ;;  %s1198_s16 = sphi %s1248_s16, %s1516_s16   ;;  %s1194_s15 = sphi %s1246_s15, %s1515_s15  }
   0xd   : > { %1501 = sst [smem:[#allocation16_spill]] %s1210_s19  ;;  %s870_s22 = sadd.s32 4294967294, %s1214_s20  }
   0xe   : > { %s39_s23 = sadd.s32 1, %s1210_s19  ;;  %s48_s24 = sadd.s32 1, %s1202_s17 }
   0xf   : > { %p41_p0 = scmp.ge.s32.totalorder %s39_s23, 2  ;;  %p55_p1 = scmp.ne.s32.totalorder %s1202_s17, %s1198_s16 }
  0x10   : > { %p56_p2 = scmp.eq.s32.totalorder %s1214_s20, 0  ;;  %p61_p3 = scmp.ne.s32.totalorder %s1198_s16, %s1194_s15 }
  0x11   : > { %s1518_s23 = smov (%p41_p0, %s39_s23), 0  ;;  %p62_p5 = scmp.eq.s32.totalorder %s1277_s21, 0 }
  0x12   : > { %1502 = sst [smem:[#allocation17_spill]] %s1518_s23  ;;  %p1289_p4 = por %p56_p2, %p55_p1 }
  0x13   : > { %s43_s26 = ssub.s32 %s1210_s19, %s1518_s23  ;;  %p139_p6 = scmp.eq.s32.totalorder %s1277_s21, 1 }
  0x14   : > { %p46_p7 = scmp.eq.s32.totalorder %s43_s26, 0  ;;  %p1297_p8 = por %p62_p5, %p61_p3 }
  0x15   : > { %p1301_p9 = por %p139_p6, %p55_p1  ;;  %p145_p10 = scmp.eq.s32.totalorder %s870_s22, 1 }
  0x16   : > { %s1306_s29 = scalar_select %p46_p7, %s1202_s17, %s48_s24  }
  0x17   : > { %p1308_p11 = por %p145_p10, %p61_p3  ;;  %p872_p12 = scmp.ge.s32.totalorder %s1214_s20, 2 }
  0x18   : > { %1506 = sst [smem:[#allocation18_spill]] %s1306_s29  ;;  %p935_p13 = scmp.lt.s32.totalorder %s1214_s20, 2 }
  0x19   : > { %s193_s5 = sand.u32 1, %s1202_s17   ;;  %s874_s7 = sshll.u32 %s1210_s19, 3 }
  0x1a   : > { %s873_s6 = sshll.u32 %s193_s5, 3  ;;  %p1318_p0 = pnand %p935_p13, %p1289_p4 }
  0x1b   : > { %s213_s9 = sand.u32 1, %s1214_s20   ;;  %s1509_s1 = sld [smem:[#allocation19_spill]] }
  0x1c   : > { %s217_s14 = scalar_lea.vmem [#allocation5], %s873_s6  ;;  %s214_s24 = scalar_lea.sflag [#allocation6], %s213_s9 }
  0x1d   : > { %s225_s22 = sshll.u32 %s217_s14, 4  ;;  %p879_p1 = scmp.ge.s32.totalorder %s1214_s20, 1  ;;  %s226_s22 = int_to_ptr.vmem [resolvable:$true] %s225_s22 }
  0x1e   : > { %p249_p2 = scmp.lt.s32.totalorder %s1214_s20, 3  ;;  %s202_s10 = scalar_lea.hbm %s1491_s0, %s874_s7 }
  0x1f   : > { %s204_s11 = sshll.u32 %s202_s10, 4  ;;  %s194_s14 = scalar_lea.sflag [#allocation3], %s193_s5  ;;  %s205_s11 = int_to_ptr.hbm [resolvable:$true] %s204_s11 }
  0x20   : > { %p1330_p3 = pnand %p879_p1, %p249_p2  ;;  %s236_s29 = scalar_lea.vmem [#allocation7], %s873_s6 }
  0x21   : > { %s221_s12 = scalar_lea.hbm %s1509_s1, %s874_s7  ;;  %s244_s17 = sshll.u32 %s236_s29, 4  ;;  %s245_s17 = int_to_ptr.vmem [resolvable:$true] %s244_s17 }
  0x22   : > { %s223_s13 = sshll.u32 %s221_s12, 4  ;;  %s197_s12 = scalar_lea.vmem [#allocation2], %s873_s6  ;;  %s224_s13 = int_to_ptr.hbm [resolvable:$true] %s223_s13 }
  0x23   : > { %924 = dma.hbm_to_vmem [thread:$0]  (!%p1318_p0), %s224_s13, 128, %s226_s22, %s214_s24  }
  0x24   : > { %s206_s1 = sshll.u32 %s197_s12, 4  ;;  %s240_s22 = scalar_lea.hbm %s1493_s2, %s874_s7  ;;  %s207_s1 = int_to_ptr.vmem [resolvable:$true] %s206_s1 }
  0x25   : > { %921 = dma.hbm_to_vmem [thread:$0]  (!%p1318_p0), %s205_s11, 128, %s207_s1, %s194_s14  }
  0x26   : > { %s242_s19 = sshll.u32 %s240_s22, 4  ;;  %253 = sbr.rel (%p1330_p3) target bundleno = 1093 (0x445), region = 32  ;;  %s243_s19 = int_to_ptr.hbm [resolvable:$true] %s242_s19 }
  0x27   : > { %927 = dma.hbm_to_vmem [thread:$0]  (!%p1318_p0), %s243_s19, 128, %s245_s17, %s214_s24  }
  0x28   : > { %s1347_s23 = sand.u32 (!%p1330_p3), 1, %s1198_s16  }
  0x29   : > { %s1350_s1 = sshll.u32 (!%p1330_p3), %s1347_s23, 3  ;;  %s256_s5 = scalar_lea.sflag (!%p1330_p3), [#allocation3], %s1347_s23 }
  0x2a   : > { %s259_s7 = scalar_lea.vmem (!%p1330_p3), [#allocation2], %s1350_s1 }
  0x2b   : > { %1177 = dma.done.wait (%p1297_p8), %s256_s5, 128  }
  0x2c   : > { %1179 = vsyncadd (%p1297_p8), %s256_s5, 4294967168  ;;  %s265_s17 = sand.u32 1, %s1277_s21   ;;  %s269_s29 = scalar_lea.vmem [#allocation5], %s1350_s1 }
  0x2d   : > { %s266_s19 = scalar_lea.sflag [#allocation6], %s265_s17 }
  0x2e   : > { %1181 = dma.done.wait (%p1297_p8), %s266_s19, 256  }
  0x2f   : > { %1183 = vsyncadd (%p1297_p8), %s266_s19, 4294967040  ;;  %vm332_vm0 = vcmask 261120   ;;  %v322_v0 = vld [vmem:[%s269_s29] sm:$0xff]  ;;  %v320_v1 = vld [vmem:[%s259_s7] sm:$0xff]  ;;  %s1216_s6 = smov 96   ;;  %s1217_s8 = smov 64   ;;  %v325_v4 = vlaneseq }
  0x30   : > { %885 = vmatpush.xpose.msk.msra.mxu0 %vm332_vm0, %v322_v0  ;;  %v321_v2 = vmul.f32 0.17677669, %v320_v1  ;;  %411 = vrot.lane.b32.xlu1 %v322_v0, %s1216_s6  ;;  %s1218_s21 = smov 32   ;;  %vm360_vm2 = vcmask 64512   ;;  %s279_s27 = scalar_lea.vmem [#allocation7], %s1350_s1 }
  0x31   : > { %493 = vrot.lane.b32.xlu2 %v322_v0, %s1217_s8  ;;  %v1372_v5 = vshrl.u32 %v325_v4, 7  ;;  %v1374_v6 = vand.u32 127, %v325_v4  ;;  %v1392_v22 = vld [vmem:[%s279_s27] sm:$0xff]  ;;  %s884_s24 = sshll.u32 %s1347_s23, 5  ;;  %s907_s10 = sshll.u32 %s1206_s18, 5 }
  0x32   : > { %403 = vmatpush.msra.mxu1 %v1392_v22  ;;  %s1405_s25 = scalar_lea.vmem [#allocation9], %s884_s24  ;;  %s704_s14 = scalar_lea.hbm %s1495_s4, %s907_s10 }
  0x33   : > { %886 = vmatmul.msk.f32.vlgmr.msra.gmra.mxu0 %vm332_vm0, %v321_v2  ;;  %vm331_vm1 = vcmp.gt.s32.totalorder %v1374_v6, %v1372_v5  ;;  %s705_s26 = sshll.u32 %s1405_s25, 4  ;;  %s707_s9 = sshll.u32 %s704_s14, 4  ;;  %s706_s26 = int_to_ptr.vmem [resolvable:$true] %s705_s26  ;;  %s708_s9 = int_to_ptr.hbm [resolvable:$true] %s707_s9 }
  0x34   : > { %s677_s13 = scalar_lea.sflag [#allocation10], %s1347_s23  ;;  %s1110_s22 = sshra.s32 %s708_s9, 4  ;;  %s1111_s22 = int_to_ptr.hbm [resolvable:$true] %s1110_s22 }
  0x35   : > { %s1112_s5 = scalar_lea.hbm %s1111_s22, 32  ;;  %s1116_s19 = scalar_lea.hbm %s1495_s4, 64 }
  0x36   : > { %p1113_p4 = scmp.ne.s32.totalorder %s1111_s22, %s1112_s5  ;;  %p1117_p7 = scmp.lt.s32.totalorder %s1111_s22, %s1495_s4 }
  0x37   : > { %p1118_p8 = scmp.lt.s32.totalorder %s1116_s19, %s1112_s5 }
  0x38   : > { %409 = vrot.lane.b32.xlu1 %v321_v2, %s1216_s6  ;;  %p1114_p5 = pnand %p1113_p4, %p1301_p9 }
  0x39   : > { %574 = vrot.lane.b32.xlu2 %v322_v0, %s1218_s21  ;;  %p1119_p10 = por %p1118_p8, %p1117_p7 }
  0x3a   : > { %p1115_p6 = pneg %p1114_p5 }
  0x3c   : > { %p1120_p13 = pnand %p1119_p10, %p1115_p6 }
  0x40   : > { %572 = vrot.lane.b32.xlu1 %v321_v2, %s1218_s21 }
  0x8b   : > { %v494_v11 = vpop.permute.xlu2 %493 }
  0x8c   : > { %892 = vmatpush.xpose.msk.msrb.mxu1 %vm332_vm0, %v494_v11 }
  0x93   : > { %v575_v12 = vpop.permute.xlu2 %574 }
  0x94   : > { %896 = vmatpush.xpose.msk.msrb.mxu0 %vm332_vm0, %v575_v12 }
  0xa2   : > { %v412_v3 = vpop.permute.xlu1 %411 }
  0xa3   : > { %888 = vmatpush.xpose.msk.msra.mxu2 %vm332_vm0, %v412_v3 }
  0xaa   : > { %v410_v7 = vpop.permute.xlu1 %409 }
  0xab   : > { %889 = vmatmul.msk.f32.vlgmr.msra.gmra.mxu2 %vm332_vm0, %v410_v7 }
  0xb0   : > { %v356_v8 = vpop.f32.mrf.mxu0 }
  0xb1   : > { %v359_v9 = vsel %vm331_vm1, -inf, %v356_v8 }
  0xb2   : > { %v361_v10 = vsel %vm360_vm2, %v359_v9, -inf  ;;  %v573_v13 = vpop.permute.xlu1 %572 }
  0xb3   : > { %362 = vmax.xlane.f32.xlu0 %v361_v10  ;;  %897 = vmatmul.msk.f32.vlgmr.msrb.gmra.mxu0 %vm332_vm0, %v573_v13 }
 0x126   : > { %v363_v14 = vpop.xlane.xlu0 %362 }
 0x127   : > { %v364_v15 = vsub.f32 %v359_v9, %v363_v14 }
 0x129   : > { %v365_v16 = vmul.f32 1.442695, %v364_v15 }
 0x12b   : > { %990 = vpow2.f32 %v365_v16 }
 0x12e   : > { %v434_v17 = vpop.f32.mrf.mxu2 }
 0x12f   : > { %v437_v18 = vsel %vm331_vm1, -inf, %v434_v17 }
 0x130   : > { %v438_v19 = vsel %vm360_vm2, %v437_v18, -inf  ;;  %v597_v23 = vpop.f32.mrf.mxu0 }
 0x131   : > { %v991_v20 = vpop.eup %990  ;;  %439 = vmax.xlane.f32.xlu2 %v438_v19  ;;  %v600_v24 = vsel %vm331_vm1, -inf, %v597_v23 }
 0x132   : > { %v367_v21 = vsel %vm360_vm2, %v991_v20, 0.0  ;;  %v601_v25 = vsel %vm360_vm2, %v600_v24, -inf }
 0x133   : > { %368 = vadd.xlane.f32.xlu0 %v367_v21 }
 0x147   : > { %491 = vrot.lane.b32.xlu0 %v321_v2, %s1217_s8 }
 0x171   : > { %602 = vmax.xlane.f32.xlu0 %v601_v25 }
 0x185   : > { %625 = vrot.lane.b32.xlu0 %v1392_v22, %s1218_s21 }
 0x1a4   : > { %v440_v26 = vpop.xlane.xlu2 %439 }
 0x1a5   : > { %v441_v27 = vsub.f32 %v437_v18, %v440_v26 }
 0x1a6   : > { %v369_v28 = vpop.xlane.xlu0 %368 }
 0x1a7   : > { %992 = vrcp.f32 %v369_v28  ;;  %v442_v29 = vmul.f32 1.442695, %v441_v27  ;;  %v381_v35 = vand.u32 2147483648, %v369_v28  ;;  %v379_v37 = vand.u32 2147483647, %v369_v28 }
 0x1a8   : > { %vm375_vm4 = vweird.f32 %v369_v28 }
 0x1a9   : > { %994 = vpow2.f32 %v442_v29  ;;  %v382_v39 = vor.u32 1.1754944e-38, %v381_v35  ;;  %vm380_vm6 = vcmp.eq.f32.partialorder %v379_v37, 8.507059e+37 }
 0x1ad   : > { %v993_v30 = vpop.eup %992 }
 0x1ae   : > { %v371_v31 = vmul.f32 %v993_v30, %v369_v28  ;;  %vm376_vm3 = vweird.f32 %v993_v30 }
 0x1af   : > { %v995_v32 = vpop.eup %994  ;;  %vm377_vm5 = vmor %vm375_vm4, %vm376_vm3 }
 0x1b0   : > { %v372_v33 = vsub.f32 1.0, %v371_v31  ;;  %v444_v34 = vsel %vm360_vm2, %v995_v32, 0.0 }
 0x1b1   : > { %445 = vadd.xlane.f32.xlu2 %v444_v34 }
 0x1b2   : > { %v373_v36 = vmul.f32 %v993_v30, %v372_v33 }
 0x1b4   : > { %v374_v38 = vadd.f32 %v993_v30, %v373_v36 }
 0x1b6   : > { %v378_v40 = vsel %vm377_vm5, %v993_v30, %v374_v38 }
 0x1b7   : > { %v383_v41 = vsel %vm380_vm6, %v382_v39, %v378_v40 }
 0x1b8   : > { %v384_v42 = vmul.f32 %v991_v20, %v383_v41 }
 0x1b9   : > { %v492_v43 = vpop.permute.xlu0 %491 }
 0x1ba   : > { %887 = vmatmul.msk.f32.vlgmr.msra.gmra.mxu1 %vm360_vm2, %v384_v42  ;;  %408 = vst.msk [vmem:[%s1405_s25] sm:$0xff] %vm360_vm2, %v384_v42 }
 0x1c2   : > { %893 = vmatmul.msk.f32.vlgmr.msrb.gmra.mxu1 %vm332_vm0, %v492_v43 }
 0x1e4   : > { %v603_v54 = vpop.xlane.xlu0 %602 }
 0x1e5   : > { %v604_v58 = vsub.f32 %v600_v24, %v603_v54 }
 0x1e7   : > { %v605_v59 = vmul.f32 1.442695, %v604_v58 }
 0x1f7   : > { %v626_v1 = vpop.permute.xlu0 %625 }
 0x1f8   : > { %646 = vmatpush.msrb.mxu2 %v626_v1 }
 0x224   : > { %v446_v44 = vpop.xlane.xlu2 %445 }
 0x225   : > { %996 = vrcp.f32 %v446_v44  ;;  %v458_v47 = vand.u32 2147483648, %v446_v44  ;;  %vm452_vm7 = vweird.f32 %v446_v44  ;;  %v456_v49 = vand.u32 2147483647, %v446_v44 }
 0x226   : > { %998 = vpow2.f32 %v605_v59 }
 0x227   : > { %v459_v51 = vor.u32 1.1754944e-38, %v458_v47  ;;  %vm457_vm10 = vcmp.eq.f32.partialorder %v456_v49, 8.507059e+37 }
 0x22b   : > { %v997_v45 = vpop.eup %996 }
 0x22c   : > { %v448_v46 = vmul.f32 %v997_v45, %v446_v44  ;;  %vm453_vm8 = vweird.f32 %v997_v45  ;;  %v999_v63 = vpop.eup %998 }
 0x22d   : > { %vm454_vm9 = vmor %vm452_vm7, %vm453_vm8  ;;  %v607_v0 = vsel %vm360_vm2, %v999_v63, 0.0 }
 0x22e   : > { %v449_v48 = vsub.f32 1.0, %v448_v46 }
 0x230   : > { %v450_v50 = vmul.f32 %v997_v45, %v449_v48 }
 0x232   : > { %v451_v52 = vadd.f32 %v997_v45, %v450_v50 }
 0x234   : > { %v455_v53 = vsel %vm454_vm9, %v997_v45, %v451_v52 }
 0x235   : > { %v460_v55 = vsel %vm457_vm10, %v459_v51, %v455_v53 }
 0x236   : > { %v461_v56 = vmul.f32 %v995_v32, %v460_v55 }
 0x237   : > { %v1410_v57 = vpop.f32.mrf.mxu1 }
 0x238   : > { %891 = vst.msk [vmem:[%s1405_s25 + $0x8] sm:$0xff] %vm360_vm2, %v461_v56 }
 0x23f   : > { %v516_v60 = vpop.f32.mrf.mxu1 }
 0x240   : > { %v519_v61 = vsel %vm331_vm1, -inf, %v516_v60 }
 0x241   : > { %v520_v62 = vsel %vm360_vm2, %v519_v61, -inf }
 0x242   : > { %521 = vmax.xlane.f32.xlu1 %v520_v62 }
 0x24a   : > { %608 = vadd.xlane.f32.xlu1 %v607_v0 }
 0x263   : > { %544 = vrot.lane.b32.xlu1 %v1392_v22, %s1217_s8 }
 0x2b5   : > { %v522_v2 = vpop.xlane.xlu1 %521 }
 0x2b6   : > { %v523_v3 = vsub.f32 %v519_v61, %v522_v2 }
 0x2b8   : > { %v524_v4 = vmul.f32 1.442695, %v523_v3 }
 0x2ba   : > { %1000 = vpow2.f32 %v524_v4 }
 0x2bd   : > { %v609_v7 = vpop.xlane.xlu1 %608 }
 0x2be   : > { %1002 = vrcp.f32 %v609_v7  ;;  %v621_v11 = vand.u32 2147483648, %v609_v7  ;;  %v619_v13 = vand.u32 2147483647, %v609_v7  ;;  %vm615_vm12 = vweird.f32 %v609_v7 }
 0x2c0   : > { %v1001_v5 = vpop.eup %1000  ;;  %v622_v15 = vor.u32 1.1754944e-38, %v621_v11  ;;  %vm620_vm14 = vcmp.eq.f32.partialorder %v619_v13, 8.507059e+37 }
 0x2c1   : > { %v526_v6 = vsel %vm360_vm2, %v1001_v5, 0.0 }
 0x2c2   : > { %527 = vadd.xlane.f32.xlu2 %v526_v6 }
 0x2c4   : > { %v1003_v8 = vpop.eup %1002 }
 0x2c5   : > { %v611_v9 = vmul.f32 %v1003_v8, %v609_v7  ;;  %vm616_vm11 = vweird.f32 %v1003_v8 }
 0x2c6   : > { %vm617_vm13 = vmor %vm615_vm12, %vm616_vm11 }
 0x2c7   : > { %v612_v10 = vsub.f32 1.0, %v611_v9 }
 0x2c9   : > { %v613_v12 = vmul.f32 %v1003_v8, %v612_v10 }
 0x2cb   : > { %v614_v14 = vadd.f32 %v1003_v8, %v613_v12 }
 0x2cd   : > { %v618_v16 = vsel %vm617_vm13, %v1003_v8, %v614_v14 }
 0x2ce   : > { %v623_v17 = vsel %vm620_vm14, %v622_v15, %v618_v16 }
 0x2cf   : > { %v624_v18 = vmul.f32 %v999_v63, %v623_v17 }
 0x2d1   : > { %898 = vmatmul.msk.f32.vlgmr.msrb.gmra.mxu2 %vm360_vm2, %v624_v18  ;;  %899 = vst.msk [vmem:[%s1405_s25 + $0x18] sm:$0xff] %vm360_vm2, %v624_v18 }
 0x2d5   : > { %v545_v24 = vpop.permute.xlu1 %544 }
 0x2da   : > { %463 = vrot.lane.b32.xlu2 %v1392_v22, %s1216_s6 }
 0x335   : > { %v528_v19 = vpop.xlane.xlu2 %527 }
 0x336   : > { %1004 = vrcp.f32 %v528_v19  ;;  %v540_v26 = vand.u32 2147483648, %v528_v19  ;;  %v538_v28 = vand.u32 2147483647, %v528_v19  ;;  %vm534_vm1 = vweird.f32 %v528_v19 }
 0x338   : > { %v541_v22 = vor.u32 1.1754944e-38, %v540_v26  ;;  %vm539_vm4 = vcmp.eq.f32.partialorder %v538_v28, 8.507059e+37 }
 0x33c   : > { %v1005_v20 = vpop.eup %1004 }
 0x33d   : > { %v530_v21 = vmul.f32 %v1005_v20, %v528_v19  ;;  %v464_v23 = vpop.permute.xlu2 %463  ;;  %vm535_vm15 = vweird.f32 %v1005_v20 }
 0x33e   : > { %484 = vmatpush.msra.mxu3 %v464_v23  ;;  %vm536_vm3 = vmor %vm534_vm1, %vm535_vm15 }
 0x33f   : > { %v531_v25 = vsub.f32 1.0, %v530_v21  ;;  %890 = vmatmul.msk.f32.vlgmr.msra.gmra.mxu3 %vm360_vm2, %v461_v56 }
 0x340   : > { %565 = vmatpush.msrb.mxu3 %v545_v24 }
 0x341   : > { %v532_v27 = vmul.f32 %v1005_v20, %v531_v25 }
 0x343   : > { %v533_v29 = vadd.f32 %v1005_v20, %v532_v27 }
 0x345   : > { %v537_v30 = vsel %vm536_vm3, %v1005_v20, %v533_v29 }
 0x346   : > { %v542_v31 = vsel %vm539_vm4, %v541_v22, %v537_v30 }
 0x347   : > { %v543_v32 = vmul.f32 %v1001_v5, %v542_v31 }
 0x349   : > { %894 = vmatmul.msk.f32.vlgmr.msrb.gmra.mxu3 %vm360_vm2, %v543_v32  ;;  %895 = vst.msk [vmem:[%s1405_s25 + $0x10] sm:$0xff] %vm360_vm2, %v543_v32 }
 0x354   : > { %v648_v33 = vpop.f32.mrf.mxu2 }
 0x355   : > { %662 = vrot.lane.b32.xlu1 %v648_v33, %s1216_s6 }
 0x3c2   : > { %v486_v34 = vpop.f32.mrf.mxu3 }
 0x3c3   : > { %654 = vrot.lane.b32.xlu2 %v486_v34, %s1218_s21 }
 0x3c4   : > { %1123 = shalt.err (!%p1120_p13)
}
 0x3c5   : > { %s1219_s21 = smov 128   ;;  %s1220_s27 = smov 8   ;;  %vm666_vm2 = vcmask 523264   ;;  %vm668_vm5 = vcmask 785408  }
 0x3c6   : > { %915 = dma.vmem_to_hbm [thread:$0]  (%p1301_p9), %s706_s26, 512, %s708_s9, %s677_s13, %s1219_s21, %s1219_s21, %s1220_s27  }
 0x3c7   : > { %s902_s24 = sshll.u32 %s1206_s18, 3  ;;  %s312_s12 = scalar_lea.vmem [#allocation8], %s1350_s1  ;;  %v663_v39 = vpop.permute.xlu1 %662 }
 0x3c8   : > { %s688_s11 = scalar_lea.hbm %s1494_s3, %s902_s24  ;;  %s690_s14 = sshll.u32 %s312_s12, 4  ;;  %s691_s14 = int_to_ptr.vmem [resolvable:$true] %s690_s14 }
 0x3c9   : > { %s692_s22 = sshll.u32 %s688_s11, 4  ;;  %s672_s18 = scalar_lea.sflag [#allocation4], %s1347_s23  ;;  %s693_s22 = int_to_ptr.hbm [resolvable:$true] %s692_s22 }
 0x3ca   : > { %s1144_s13 = scalar_lea.hbm %s1494_s3, 16 }
 0x3cc   : > { %v567_v35 = vpop.f32.mrf.mxu3 }
 0x3cd   : > { %658 = vrot.lane.b32.xlu0 %v567_v35, %s1217_s8  ;;  %s1138_s8 = sshra.s32 %s693_s22, 4  ;;  %s1139_s8 = int_to_ptr.hbm [resolvable:$true] %s1138_s8 }
 0x3ce   : > { %s1140_s26 = scalar_lea.hbm %s1139_s8, 8  ;;  %p1145_p3 = scmp.lt.s32.totalorder %s1139_s8, %s1494_s3 }
 0x3cf   : > { %p1141_p0 = scmp.ne.s32.totalorder %s1139_s8, %s1140_s26  ;;  %p1146_p4 = scmp.lt.s32.totalorder %s1144_s13, %s1140_s26 }
 0x3d1   : > { %p1142_p1 = pnand %p1141_p0, %p1301_p9  ;;  %p1147_p5 = por %p1146_p4, %p1145_p3 }
 0x3d3   : > { %p1143_p2 = pneg %p1142_p1 }
 0x3d5   : > { %p1148_p6 = pnand %p1147_p5, %p1143_p2 }
 0x41d   : > { %v655_v36 = vpop.permute.xlu2 %654 }
 0x41e   : > { %v665_v37 = vsel %vm332_vm0, %v1410_v57, %v655_v36 }
 0x43f   : > { %v659_v38 = vpop.permute.xlu0 %658 }
 0x440   : > { %v667_v40 = vsel %vm666_vm2, %v665_v37, %v659_v38 }
 0x441   : > { %v669_v41 = vsel %vm668_vm5, %v667_v40, %v663_v39 }
 0x442   : > { %670 = vst [vmem:[%s312_s12] sm:$0xff] %v669_v41 }
 0x443   : > { %1151 = shalt.err (!%p1148_p6)
}
 0x444   : > { %914 = dma.vmem_to_hbm [thread:$0]  (%p1301_p9), %s691_s14, 128, %s693_s22, %s672_s18  }
 0x445 PF: > { %s722_s23 = sand.u32 1, %s1194_s15   ;;  %p929_p7 = pnand %p872_p12, %p1308_p11 }
 0x446   : > { %s723_s17 = scalar_lea.sflag [#allocation4], %s722_s23 }
 0x447   : > { %p930_p8 = pneg %p929_p7 }
 0x449   : > { %1185 = dma.done.wait (%p930_p8), %s723_s17, 128  }
 0x44a   : > { %1187 = vsyncadd (%p930_p8), %s723_s17, 4294967168  ;;  %s733_s19 = scalar_lea.sflag [#allocation10], %s722_s23 }
 0x44b   : > { %1189 = dma.done.wait (%p930_p8), %s733_s19, 512  }
 0x44c   : > { %1191 = vsyncadd (%p930_p8), %s733_s19, 4294966784  ;;  %s27_s20 = sadd.s32 1, %s1214_s20   ;;  %s1511_s28 = sld [smem:[#allocation15_spill]] }
 0x44d   : > { %p24_p10 = scmp.ge.s32.totalorder %s27_s20, 4   ;;  %s1512_s17 = sld [smem:[#allocation18_spill]] }
 0x44e   : > { %s1513_s18 = sld [smem:[#allocation16_spill]]  ;;  %s1515_s15 = smov %s1198_s16 }
 0x44f   : > { %s1514_s19 = sld [smem:[#allocation17_spill]]  ;;  %26 = sbr.rel (!%p24_p10) target bundleno = 12 (0xc), region = 121 }
 0x452   : > { %s1516_s16 = smov %s1511_s28 }
 0x454   :  { %739 = vsyncpa [#allocation3], 1 }
 0x455   :  { %741 = vsyncpa [#allocation3 + $0x1], 1 }
 0x456   :  { %742 = vsyncpa [#allocation6], 1 }
 0x457   :  { %744 = vsyncpa [#allocation6 + $0x1], 1 }
 0x458   :  { %745 = vsyncpa [#allocation4], 1 }
 0x459   :  { %747 = vsyncpa [#allocation4 + $0x1], 1 }
 0x45a   :  { %748 = vsyncpa [#allocation10], 1 }
 0x45b   :  { %750 = vsyncpa [#allocation10 + $0x1], 1 }

</bundles_post_ra>
